<compile_context>
chip_gen: v5e
topology: v5e:2x2
jax: 0.10.0
libtpu: 0.0.40
codegen_flags: <defaults>
</compile_context>

<pallas_src>
import jax
import jax.numpy as jnp
from jax.experimental import pallas as pl
from jax.experimental.pallas import tpu as pltpu


def mlp_softmax_kernel(x_ref, w1_ref, b1_ref, w2_ref, b2_ref, o_ref):
    # x tile: [tile_b, S0] bf16.  Upcast + one XLU transpose puts the batch on
    # the 128-lane axis; everything downstream is lane-dense.
    x_t = x_ref[...].astype(jnp.float32).T                      # [S0, tile_b]

    # fc1: W1 [S1, S0] @ x_t -> [S1, tile_b]; bias is a column vector.
    h = jnp.dot(w1_ref[...], x_t, preferred_element_type=jnp.float32)
    h = jnp.maximum(h + b1_ref[...], 0.0)

    # fc2: W2 [C, S1] @ h -> [C, tile_b]
    z = jnp.dot(w2_ref[...], h, preferred_element_type=jnp.float32)
    z = jnp.maximum(z + b2_ref[...], 0.0)

    # softmax over the class axis (now axis 0 = 8 sublanes): cheap reduction.
    z = z - jnp.max(z, axis=0, keepdims=True)
    e = jnp.exp(z)
    # Exact division (NOT approx reciprocal) so each column sums to 1 exactly
    # up to f32 rounding -- this was the failing check previously.
    o_ref[...] = (e / jnp.sum(e, axis=0, keepdims=True)).astype(o_ref.dtype)


def neural_network_forward(x, w1, b1, w2, b2, *, tile_b=1024):
    """Fused Pallas forward pass.

    x:  [B, S0]   (bf16 recommended; x dominates HBM traffic)
    w1: [S1, S0] f32 (torch nn.Linear layout), b1: [S1, 1] f32
    w2: [C,  S1] f32,                          b2: [C,  1] f32
    returns [B, C] f32 softmax probabilities.
    """
    B, S0 = x.shape
    S1 = w1.shape[0]
    C = w2.shape[0]

    # Clamp the tile so tiny batches don't get padded up to a full default tile.
    tile_b = max(8, min(tile_b, B))
    n_tiles = pl.cdiv(B, tile_b)
    Bp = n_tiles * tile_b
    if Bp != B:
        # Prefer choosing tile_b dividing B: this pad is an extra HBM pass over x.
        x = jnp.pad(x, ((0, Bp - B), (0, 0)))

    out = pl.pallas_call(
        mlp_softmax_kernel,
        # Output is produced lane-dense as [C, Bp] (batch on lanes).
        out_shape=jax.ShapeDtypeStruct((C, Bp), jnp.float32),
        grid=(n_tiles,),
        in_specs=[
            # x: one batch tile per grid step (streamed, double-buffered).
            pl.BlockSpec((tile_b, S0), lambda i: (i, 0)),
            # Weights / biases: constant index_map -> VMEM-resident across steps.
            pl.BlockSpec((S1, S0), lambda i: (0, 0)),
            pl.BlockSpec((S1, 1), lambda i: (0, 0)),
            pl.BlockSpec((C, S1), lambda i: (0, 0)),
            pl.BlockSpec((C, 1), lambda i: (0, 0)),
        ],
        out_specs=pl.BlockSpec((C, tile_b), lambda i: (0, i)),
        compiler_params=pltpu.CompilerParams(
            dimension_semantics=("parallel",)   # v7x: shards tiles across both TCs
        ),
    )(x, w1, b1, w2, b2)

    if Bp != B:
        out = out[:, :B]
    # Wrapper-side layout plumbing back to the module's [B, C] contract.
    # Callers that can consume [C, B] directly may skip this transpose.
    return out.T


def init_linear_params(key, in_features, out_features):
    """torch.nn.Linear-style init U(-1/sqrt(in), 1/sqrt(in)).

    Weight kept in torch's native [out, in] layout (the kernel runs in the
    transposed [features, batch] orientation, so no transpose is ever needed).
    Bias is a column vector [out, 1] so it broadcasts along the lane (batch) axis.
    """
    kw, kb = jax.random.split(key)
    bound = 1.0 / jnp.sqrt(jnp.float32(in_features))
    w = jax.random.uniform(
        kw, (out_features, in_features), jnp.float32, minval=-bound, maxval=bound
    )
    b = jax.random.uniform(
        kb, (out_features, 1), jnp.float32, minval=-bound, maxval=bound
    )
    return w, b


def reference_forward(x, w1, b1, w2, b2):
    xf = x.astype(jnp.float32)
    h = jnp.maximum(xf @ w1.T + b1.T, 0.0)
    z = jnp.maximum(h @ w2.T + b2.T, 0.0)
    return jax.nn.softmax(z, axis=1)


if __name__ == "__main__":
    # NeuralNetwork(n=3, Sl=[16, 32, 8], activation_function='relu')
    B, S0, S1, S2 = 256, 16, 32, 8
    TILE_B = 128  # divides B (no pad pass) and gives 2 grid steps (both v7x TCs busy)

    key = jax.random.PRNGKey(0)
    kx, k1, k2 = jax.random.split(key, 3)

    # x in bf16: halves x's HBM traffic; matmul accumulates in f32 on the MXU.
    x = jax.random.normal(kx, (B, S0), jnp.float32).astype(jnp.bfloat16)
    w1, b1 = init_linear_params(k1, S0, S1)
    w2, b2 = init_linear_params(k2, S1, S2)

    out = neural_network_forward(x, w1, b1, w2, b2, tile_b=TILE_B)
    out = jax.block_until_ready(out)

    ref = reference_forward(x, w1, b1, w2, b2)
    assert out.shape == (B, S2)
    assert jnp.allclose(out, ref, atol=1e-3, rtol=1e-3)
    # Exact softmax division -> rows sum to 1 to f32 precision.
    assert jnp.allclose(jnp.sum(out, axis=1), jnp.ones((B,)), atol=1e-3)

    print("KERNEL_OK")
</pallas_src>

<mosaic_0001>
module attributes {stable_mosaic.version = 11 : i64} {
  func.func @mlp_softmax_kernel(%arg0: i32, %arg1: memref<128x16xbf16, #tpu.memory_space<vmem>>, %arg2: memref<32x16xf32, #tpu.memory_space<vmem>>, %arg3: memref<32x1xf32, #tpu.memory_space<vmem>>, %arg4: memref<8x32xf32, #tpu.memory_space<vmem>>, %arg5: memref<8x1xf32, #tpu.memory_space<vmem>>, %arg6: memref<8x128xf32, #tpu.memory_space<vmem>>) attributes {dimension_semantics = [#tpu.dimension_semantics<parallel>], iteration_bounds = array<i64: 2>, scalar_prefetch = 0 : i64, scratch_operands = 0 : i64, tpu.core_type = #tpu.core_type<tc>, window_params = [{transform_indices = @transform_0, window_bounds = array<i64: 128, 16>}, {pipeline_mode = #tpu.pipeline_mode<synchronous>, transform_indices = @transform_1, window_bounds = array<i64: 32, 16>}, {pipeline_mode = #tpu.pipeline_mode<synchronous>, transform_indices = @transform_2, window_bounds = array<i64: 32, 1>}, {pipeline_mode = #tpu.pipeline_mode<synchronous>, transform_indices = @transform_3, window_bounds = array<i64: 8, 32>}, {pipeline_mode = #tpu.pipeline_mode<synchronous>, transform_indices = @transform_4, window_bounds = array<i64: 8, 1>}, {transform_indices = @transform_5, window_bounds = array<i64: 8, 128>}]} {
    %c0 = arith.constant 0 : index
    %c0_0 = arith.constant 0 : index
    %0 = vector.load %arg1[%c0, %c0_0] : memref<128x16xbf16, #tpu.memory_space<vmem>>, vector<128x16xbf16>
    %1 = arith.extf %0 : vector<128x16xbf16> to vector<128x16xf32>
    %2 = tpu.transpose %1, [1, 0] : vector<128x16xf32> -> vector<16x128xf32>
    %c0_1 = arith.constant 0 : index
    %c0_2 = arith.constant 0 : index
    %3 = vector.load %arg2[%c0_1, %c0_2] : memref<32x16xf32, #tpu.memory_space<vmem>>, vector<32x16xf32>
    %cst = arith.constant dense<0.000000e+00> : vector<32x128xf32>
    %4 = tpu.matmul %3, %2, %cst {dimension_numbers = #tpu.dot_dimension_numbers<[1], [0], [0], [1], [0, 0, 1, 1], [], []>} : vector<32x16xf32>, vector<16x128xf32>, vector<32x128xf32> -> vector<32x128xf32>
    %c0_3 = arith.constant 0 : index
    %c0_4 = arith.constant 0 : index
    %5 = vector.load %arg3[%c0_3, %c0_4] : memref<32x1xf32, #tpu.memory_space<vmem>>, vector<32x1xf32>
    %6 = vector.broadcast %5 : vector<32x1xf32> to vector<32x128xf32>
    %7 = arith.addf %4, %6 : vector<32x128xf32>
    %cst_5 = arith.constant 0.000000e+00 : f32
    %8 = vector.broadcast %cst_5 : f32 to vector<32x128xf32>
    %9 = arith.maximumf %7, %8 : vector<32x128xf32>
    %c0_6 = arith.constant 0 : index
    %c0_7 = arith.constant 0 : index
    %10 = vector.load %arg4[%c0_6, %c0_7] : memref<8x32xf32, #tpu.memory_space<vmem>>, vector<8x32xf32>
    %cst_8 = arith.constant dense<0.000000e+00> : vector<8x128xf32>
    %11 = tpu.matmul %10, %9, %cst_8 {dimension_numbers = #tpu.dot_dimension_numbers<[1], [0], [0], [1], [0, 0, 1, 1], [], []>} : vector<8x32xf32>, vector<32x128xf32>, vector<8x128xf32> -> vector<8x128xf32>
    %c0_9 = arith.constant 0 : index
    %c0_10 = arith.constant 0 : index
    %12 = vector.load %arg5[%c0_9, %c0_10] : memref<8x1xf32, #tpu.memory_space<vmem>>, vector<8x1xf32>
    %13 = vector.broadcast %12 : vector<8x1xf32> to vector<8x128xf32>
    %14 = arith.addf %11, %13 : vector<8x128xf32>
    %cst_11 = arith.constant 0.000000e+00 : f32
    %15 = vector.broadcast %cst_11 : f32 to vector<8x128xf32>
    %16 = arith.maximumf %14, %15 : vector<8x128xf32>
    %cst_12 = arith.constant dense<0xFF800000> : vector<128xf32>
    %17 = vector.multi_reduction <maximumf>, %16, %cst_12 [0] : vector<8x128xf32> to vector<128xf32>
    %18 = vector.shape_cast %17 : vector<128xf32> to vector<1x128xf32>
    %19 = vector.broadcast %18 : vector<1x128xf32> to vector<8x128xf32>
    %20 = arith.subf %16, %19 : vector<8x128xf32>
    %21 = math.exp %20 : vector<8x128xf32>
    %cst_13 = arith.constant dense<0.000000e+00> : vector<128xf32>
    %22 = vector.multi_reduction <add>, %21, %cst_13 [0] : vector<8x128xf32> to vector<128xf32>
    %23 = vector.shape_cast %22 : vector<128xf32> to vector<1x128xf32>
    %24 = vector.broadcast %23 : vector<1x128xf32> to vector<8x128xf32>
    %25 = arith.divf %21, %24 : vector<8x128xf32>
    %c0_14 = arith.constant 0 : index
    %c0_15 = arith.constant 0 : index
    %26 = vector.load %arg6[%c0_14, %c0_15] : memref<8x128xf32, #tpu.memory_space<vmem>>, vector<8x128xf32>
    tpu.vector_store %arg6[%c0_14, %c0_15], %25 {strides = array<i32>} : memref<8x128xf32, #tpu.memory_space<vmem>>, vector<8x128xf32>,
    return
  }
  func.func @transform_0(%arg0: i32) -> (i32, i32) {
    %c0_i32 = arith.constant 0 : i32
    %c0_i32_0 = arith.constant 0 : i32
    return %arg0, %c0_i32 : i32, i32
  }
  func.func @transform_1(%arg0: i32) -> (i32, i32) {
    %c0_i32 = arith.constant 0 : i32
    %c0_i32_0 = arith.constant 0 : i32
    %c0_i32_1 = arith.constant 0 : i32
    return %c0_i32, %c0_i32_0 : i32, i32
  }
  func.func @transform_2(%arg0: i32) -> (i32, i32) {
    %c0_i32 = arith.constant 0 : i32
    %c0_i32_0 = arith.constant 0 : i32
    %c0_i32_1 = arith.constant 0 : i32
    return %c0_i32, %c0_i32_0 : i32, i32
  }
  func.func @transform_3(%arg0: i32) -> (i32, i32) {
    %c0_i32 = arith.constant 0 : i32
    %c0_i32_0 = arith.constant 0 : i32
    %c0_i32_1 = arith.constant 0 : i32
    return %c0_i32, %c0_i32_0 : i32, i32
  }
  func.func @transform_4(%arg0: i32) -> (i32, i32) {
    %c0_i32 = arith.constant 0 : i32
    %c0_i32_0 = arith.constant 0 : i32
    %c0_i32_1 = arith.constant 0 : i32
    return %c0_i32, %c0_i32_0 : i32, i32
  }
  func.func @transform_5(%arg0: i32) -> (i32, i32) {
    %c0_i32 = arith.constant 0 : i32
    %c0_i32_0 = arith.constant 0 : i32
    return %c0_i32, %arg0 : i32, i32
  }
}

</mosaic_0001>

<bundles_post_ra>
// kernel: tpu_custom_call.1
= control target key start
LH: loop header
LB: loop body
LE: loop exit
PB: predicated region body
PF: predicated region fallthrough
CT: control target
= control target key end

     0   :  { %10 = vsyncpa [#allocation3], 0  ;;  %s938_s0 = inlined_call_operand.vmem [shape: bf16[256,16], index: 0, kind: input, shape index: {}]   ;;  %s939_s1 = inlined_call_operand.vmem [shape: f32[32,16], index: 1, kind: input, shape index: {}]   ;;  %s940_s2 = inlined_call_operand.vmem [shape: f32[32,1], index: 2, kind: input, shape index: {}]   ;;  %s941_s3 = inlined_call_operand.vmem [shape: f32[8,32], index: 3, kind: input, shape index: {}]   ;;  %s942_s4 = inlined_call_operand.vmem [shape: f32[8,1], index: 4, kind: input, shape index: {}]   ;;  %s943_s5 = inlined_call_operand.hbm [shape: f32[8,256], index: 5, kind: output, shape index: {}]  }
   0x1   :  { %12 = vsyncpa [#allocation3 + $0x1], 0  ;;  %s762_s18 = smov 0   ;;  %s764_s19 = smov 0  }
   0x2   :  { %s766_s20 = smov 0   ;;  %s768_s21 = smov 0  }
   0x3 LB: > { %s783_s22 = sadd.s32 4294967295, %s729_s21   ;;  %s517_s23 = sadd.s32 4294967294, %s729_s21   ;;  %s729_s21 = sphi %s768_s21, %s949_s21   ;;  %s725_s20 = sphi %s766_s20, %s948_s20   ;;  %s721_s19 = sphi %s764_s19, %s947_s19   ;;  %s717_s18 = sphi %s762_s18, %s946_s18  }
   0x4   : > { %s787_s24 = sadd.s32 1, %s729_s21   ;;  %s135_s25 = sadd.s32 1, %s725_s20 }
   0x5   : > { %s132_s26 = ssub.s32 %s729_s21, %s787_s24  ;;  %p145_p0 = scmp.ne.s32.totalorder %s725_s20, %s721_s19 }
   0x6   : > { %p133_p1 = scmp.eq.s32.totalorder %s132_s26, 0  ;;  %p146_p2 = scmp.eq.s32.totalorder %s783_s22, 1 }
   0x7   : > { %p151_p3 = scmp.ne.s32.totalorder %s721_s19, %s717_s18  ;;  %p152_p4 = scmp.eq.s32.totalorder %s517_s23, 1 }
   0x8   : > { %s798_s27 = scalar_select %p133_p1, %s725_s20, %s135_s25  }
   0x9   : > { %p800_p5 = por %p146_p2, %p145_p0  ;;  %p804_p6 = por %p152_p4, %p151_p3 }
   0xa   : > { %p520_p7 = scmp.ge.s32.totalorder %s729_s21, 1  ;;  %p191_p8 = scmp.lt.s32.totalorder %s729_s21, 3 }
   0xc   : > { %p192_p9 = pnand %p520_p7, %p191_p8 }
   0xd   : > { %s522_s30 = sshll.u32 (!%p192_p9), %s783_s22, 4  ;;  %s216_s14 = sand.u32 (!%p192_p9), 1, %s721_s19  }
   0xe   : > { %195 = sbr.rel (%p192_p9) target bundleno = 426 (0x1aa), region = 40  ;;  %p220_p10 = scmp.lt.s32.totalorder (!%p192_p9), %s522_s30, 31 }
   0xf   : > { %s521_s15 = sshll.u32 (!%p192_p9), %s216_s14, 3  ;;  %s546_s16 = sshll.u32 (!%p192_p9), %s783_s22, 3 }
  0x10   : > { %s453_s25 = scalar_lea.hbm (!%p192_p9), %s943_s5, %s546_s16  ;;  %s218_s26 = scalar_lea.vmem (!%p192_p9), [#allocation2], %s521_s15 }
  0x11   : > { %s443_s22 = scalar_lea.sflag (!%p192_p9), [#allocation3], %s216_s14  ;;  %s687_s11 = scalar_lea.hbm (!%p192_p9), %s943_s5, 16 }
  0x13   : > { %s951_s30 = smov (!%p220_p10, %s522_s30), 31  ;;  %vm285_vm0 = vcmask 130048   ;;  %v731_v16 = vmov 0   ;;  %v264_v18 = vld [vmem:[%s940_s2 + $0x18] sm:$0xff]  ;;  %v262_v19 = vld [vmem:[%s940_s2 + $0x8] sm:$0xff]  ;;  %v263_v23 = vld [vmem:[%s940_s2 + $0x10] sm:$0xff] }
  0x14   : > { %s523_s6 = sshll.u32 %s951_s30, 2  ;;  %660 = vset.pattern.permute.xlu0 %v731_v16  ;;  %661 = vset.pattern.permute.xlu1 %v731_v16  ;;  %v261_v24 = vld [vmem:[%s940_s2] sm:$0xff]  ;;  %v259_v29 = vld [vmem:[%s939_s1 + $0x10] sm:$0xff]  ;;  %v258_v30 = vld [vmem:[%s939_s1 + $0x8] sm:$0xff]  ;;  %vm386_vm1 = vcmask 261120   ;;  %s455_s30 = sshll.u32 %s218_s26, 4  ;;  %s456_s30 = int_to_ptr.vmem [resolvable:$true] %s455_s30 }
  0x15   : > { %s814_s9 = scalar_lea.vmem %s938_s0, %s523_s6  ;;  %662 = vset.pattern.permute.xlu2 %v731_v16  ;;  %282 = vperm.xlu0 %660, %v264_v18   ;;  %v257_v31 = vld [vmem:[%s939_s1] sm:$0xff]  ;;  %v260_v32 = vld [vmem:[%s939_s1 + $0x18] sm:$0xff]  ;;  %s457_s6 = sshll.u32 %s453_s25, 4  ;;  %s458_s6 = int_to_ptr.hbm [resolvable:$true] %s457_s6 }
  0x16   : > { %v587_v0 = vld [vmem:[%s814_s9 + $0x38] sm:$0xff]   ;;  %v586_v3 = vld [vmem:[%s814_s9 + $0x30] sm:$0xff]   ;;  %v585_v6 = vld [vmem:[%s814_s9 + $0x28] sm:$0xff]   ;;  %272 = vperm.xlu1 %661, %v262_v19   ;;  %s681_s7 = sshra.s32 %s458_s6, 4  ;;  %s682_s7 = int_to_ptr.hbm [resolvable:$true] %s681_s7 }
  0x17   : > { %v580_v1 = vunpack.c.h.bf16 %v587_v0  ;;  %v579_v2 = vunpack.c.l.bf16 %v587_v0  ;;  %v576_v4 = vunpack.c.h.bf16 %v586_v3  ;;  %v575_v5 = vunpack.c.l.bf16 %v586_v3  ;;  %v584_v9 = vld [vmem:[%s814_s9 + $0x20] sm:$0xff]   ;;  %v583_v12 = vld [vmem:[%s814_s9 + $0x18] sm:$0xff]   ;;  %v582_v15 = vld [vmem:[%s814_s9 + $0x10] sm:$0xff]   ;;  %s683_s8 = scalar_lea.hbm %s682_s7, 8  ;;  %p688_p0 = scmp.lt.s32.totalorder %s682_s7, %s943_s5 }
  0x18   : > { %v572_v7 = vunpack.c.h.bf16 %v585_v6  ;;  %v571_v8 = vunpack.c.l.bf16 %v585_v6  ;;  %v568_v10 = vunpack.c.h.bf16 %v584_v9  ;;  %v567_v11 = vunpack.c.l.bf16 %v584_v9  ;;  %v581_v21 = vld [vmem:[%s814_s9 + $0x8] sm:$0xff]   ;;  %v550_v26 = vld [vmem:[%s814_s9] sm:$0xff]   ;;  %p684_p11 = scmp.ne.s32.totalorder %s682_s7, %s683_s8  ;;  %p689_p1 = scmp.lt.s32.totalorder %s687_s11, %s683_s8 }
  0x19   : > { %589 = vmatpush.xpose.msk.msra.mxu3 %vm285_vm0, %v580_v1  ;;  %588 = vmatpush.xpose.msk.msra.mxu2 %vm285_vm0, %v580_v1  ;;  %v564_v13 = vunpack.c.h.bf16 %v583_v12  ;;  %v563_v14 = vunpack.c.l.bf16 %v583_v12  ;;  %v560_v17 = vunpack.c.h.bf16 %v582_v15  ;;  %v559_v20 = vunpack.c.l.bf16 %v582_v15  ;;  %v380_v33 = vld [vmem:[%s942_s4] sm:$0xff] }
  0x1a   : > { %524 = vmatpush.xpose.msk.msra.mxu0 %vm285_vm0, %v580_v1  ;;  %v556_v22 = vunpack.c.h.bf16 %v581_v21  ;;  %v555_v25 = vunpack.c.l.bf16 %v581_v21  ;;  %v552_v27 = vunpack.c.h.bf16 %v550_v26  ;;  %v551_v28 = vunpack.c.l.bf16 %v550_v26  ;;  %383 = vperm.xlu2 %662, %v380_v33   ;;  %v379_v50 = vld [vmem:[%s941_s3] sm:$0xff]  ;;  %p685_p12 = pnand %p684_p11, %p800_p5  ;;  %p690_p2 = por %p689_p1, %p688_p0 }
  0x1c   : > { %p686_p13 = pneg %p685_p12 }
  0x1d   : > { %591 = vmatpush.xpose.msk.msra.mxu3 %vm285_vm0, %v579_v2  ;;  %590 = vmatpush.xpose.msk.msra.mxu2 %vm285_vm0, %v579_v2 }
  0x1e   : > { %525 = vmatpush.xpose.msk.msra.mxu0 %vm285_vm0, %v579_v2  ;;  %277 = vperm.xlu0 %660, %v263_v23   ;;  %p691_p3 = pnand %p690_p2, %p686_p13 }
  0x1f   : > { %267 = vperm.xlu1 %661, %v261_v24  }
  0x21   : > { %593 = vmatpush.xpose.msk.msra.mxu3 %vm285_vm0, %v576_v4  ;;  %592 = vmatpush.xpose.msk.msra.mxu2 %vm285_vm0, %v576_v4 }
  0x22   : > { %526 = vmatpush.xpose.msk.msra.mxu0 %vm285_vm0, %v576_v4 }
  0x25   : > { %595 = vmatpush.xpose.msk.msra.mxu3 %vm285_vm0, %v575_v5  ;;  %594 = vmatpush.xpose.msk.msra.mxu2 %vm285_vm0, %v575_v5 }
  0x26   : > { %527 = vmatpush.xpose.msk.msra.mxu0 %vm285_vm0, %v575_v5 }
  0x29   : > { %597 = vmatpush.xpose.msk.msra.mxu3 %vm285_vm0, %v572_v7  ;;  %596 = vmatpush.xpose.msk.msra.mxu2 %vm285_vm0, %v572_v7 }
  0x2a   : > { %528 = vmatpush.xpose.msk.msra.mxu0 %vm285_vm0, %v572_v7 }
  0x2d   : > { %599 = vmatpush.xpose.msk.msra.mxu3 %vm285_vm0, %v571_v8  ;;  %598 = vmatpush.xpose.msk.msra.mxu2 %vm285_vm0, %v571_v8 }
  0x2e   : > { %529 = vmatpush.xpose.msk.msra.mxu0 %vm285_vm0, %v571_v8 }
  0x31   : > { %601 = vmatpush.xpose.msk.msra.mxu3 %vm285_vm0, %v568_v10  ;;  %600 = vmatpush.xpose.msk.msra.mxu2 %vm285_vm0, %v568_v10 }
  0x32   : > { %530 = vmatpush.xpose.msk.msra.mxu0 %vm285_vm0, %v568_v10 }
  0x35   : > { %603 = vmatpush.xpose.msk.msra.mxu3 %vm285_vm0, %v567_v11  ;;  %602 = vmatpush.xpose.msk.msra.mxu2 %vm285_vm0, %v567_v11 }
  0x36   : > { %531 = vmatpush.xpose.msk.msra.mxu0 %vm285_vm0, %v567_v11 }
  0x39   : > { %605 = vmatpush.xpose.msk.msra.mxu3 %vm285_vm0, %v564_v13  ;;  %604 = vmatpush.xpose.msk.msra.mxu2 %vm285_vm0, %v564_v13 }
  0x3a   : > { %532 = vmatpush.xpose.msk.msra.mxu0 %vm285_vm0, %v564_v13 }
  0x3d   : > { %607 = vmatpush.xpose.msk.msra.mxu3 %vm285_vm0, %v563_v14  ;;  %606 = vmatpush.xpose.msk.msra.mxu2 %vm285_vm0, %v563_v14 }
  0x3e   : > { %533 = vmatpush.xpose.msk.msra.mxu0 %vm285_vm0, %v563_v14 }
  0x41   : > { %609 = vmatpush.xpose.msk.msra.mxu3 %vm285_vm0, %v560_v17  ;;  %608 = vmatpush.xpose.msk.msra.mxu2 %vm285_vm0, %v560_v17 }
  0x42   : > { %534 = vmatpush.xpose.msk.msra.mxu0 %vm285_vm0, %v560_v17 }
  0x45   : > { %611 = vmatpush.xpose.msk.msra.mxu3 %vm285_vm0, %v559_v20  ;;  %610 = vmatpush.xpose.msk.msra.mxu2 %vm285_vm0, %v559_v20 }
  0x46   : > { %535 = vmatpush.xpose.msk.msra.mxu0 %vm285_vm0, %v559_v20 }
  0x49   : > { %613 = vmatpush.xpose.msk.msra.mxu3 %vm285_vm0, %v556_v22  ;;  %612 = vmatpush.xpose.msk.msra.mxu2 %vm285_vm0, %v556_v22 }
  0x4a   : > { %536 = vmatpush.xpose.msk.msra.mxu0 %vm285_vm0, %v556_v22 }
  0x4d   : > { %615 = vmatpush.xpose.msk.msra.mxu3 %vm285_vm0, %v555_v25  ;;  %614 = vmatpush.xpose.msk.msra.mxu2 %vm285_vm0, %v555_v25 }
  0x4e   : > { %537 = vmatpush.xpose.msk.msra.mxu0 %vm285_vm0, %v555_v25 }
  0x51   : > { %617 = vmatpush.xpose.msk.msra.mxu3 %vm285_vm0, %v552_v27  ;;  %616 = vmatpush.xpose.msk.msra.mxu2 %vm285_vm0, %v552_v27 }
  0x52   : > { %538 = vmatpush.xpose.msk.msra.mxu0 %vm285_vm0, %v552_v27 }
  0x55   : > { %619 = vmatpush.xpose.msk.msra.mxu3 %vm285_vm0, %v551_v28  ;;  %618 = vmatpush.xpose.msk.msra.mxu2 %vm285_vm0, %v551_v28 }
  0x56   : > { %539 = vmatpush.xpose.msk.msra.mxu0 %vm285_vm0, %v551_v28 }
  0x58   : > { %542 = vmatmul.msk.f32.vlgmr.msra.gmra.mxu3 %vm285_vm0, %v259_v29  ;;  %541 = vmatmul.msk.f32.vlgmr.msra.gmra.mxu2 %vm285_vm0, %v258_v30 }
  0x59   : > { %540 = vmatmul.msk.f32.vlgmr.msra.gmra.mxu0 %vm285_vm0, %v257_v31 }
  0x60   : > { %543 = vmatmul.msk.f32.gmra.mxu3 %vm285_vm0, %v260_v32 }
  0x74   : > { %v384_v51 = vpop.permute.xlu2 %383 }
  0x87   : > { %v283_v34 = vpop.permute.xlu0 %282 }
  0x88   : > { %v273_v35 = vpop.permute.xlu1 %272 }
  0x90   : > { %v278_v37 = vpop.permute.xlu0 %277 }
  0x91   : > { %v268_v42 = vpop.permute.xlu1 %267 }
  0xd6   : > { %v363_v43 = vpop.f32.mrf.mxu0 }
  0xd7   : > { %v364_v47 = vadd.f32 %v363_v43, %v268_v42 }
  0xd9   : > { %v375_v49 = vmax.f32 %v364_v47, 0.0 }
  0xdb   : > { %v369_v36 = vpop.f32.mrf.mxu3  ;;  %v366_v38 = vpop.f32.mrf.mxu2 }
  0xdc   : > { %v370_v40 = vadd.f32 %v369_v36, %v278_v37  ;;  %v367_v44 = vadd.f32 %v366_v38, %v273_v35 }
  0xde   : > { %v377_v46 = vmax.f32 %v370_v40, 0.0  ;;  %v376_v48 = vmax.f32 %v367_v44, 0.0 }
  0xe3   : > { %v372_v39 = vpop.f32.mrf.mxu3 }
  0xe4   : > { %v373_v41 = vadd.f32 %v372_v39, %v283_v34 }
  0xe6   : > { %v378_v45 = vmax.f32 %v373_v41, 0.0 }
  0xe8   : > { %402 = vmatpush.msra.mxu1 %v378_v45 }
  0xea   : > { %403 = vmatpush.msra.mxu1 %v377_v46 }
  0xec   : > { %404 = vmatpush.msra.mxu1 %v376_v48 }
  0xee   : > { %405 = vmatpush.msra.mxu1 %v375_v49 }
  0xef   : > { %544 = vmatmul.msk.f32.vlgmr.msra.gmra.mxu1 %vm386_vm1, %v379_v50 }
 0x16c   : > { %v407_v52 = vpop.f32.mrf.mxu1 }
 0x16d   : > { %v408_v53 = vadd.f32 %v407_v52, %v384_v51 }
 0x16f   : > { %v410_v54 = vmax.f32 %v408_v53, 0.0 }
 0x171   : > { %v411_v55 = vrot.slane %v410_v54, 4 }
 0x173   : > { %v412_v56 = vmax.f32 %v410_v54, %v411_v55 }
 0x175   : > { %v413_v57 = vrot.slane %v412_v56, 2 }
 0x177   : > { %v414_v58 = vmax.f32 %v412_v56, %v413_v57 }
 0x179   : > { %v415_v59 = vrot.slane %v414_v58, 1 }
 0x17b   : > { %v416_v60 = vmax.f32 %v414_v58, %v415_v59 }
 0x17d   : > { %v417_v61 = vsub.f32 %v410_v54, %v416_v60 }
 0x17f   : > { %v418_v62 = vmul.f32 1.442695, %v417_v61 }
 0x181   : > { %663 = vpow2.f32 %v418_v62 }
 0x187   : > { %v664_v63 = vpop.eup %663 }
 0x188   : > { %v420_v0 = vrot.slane %v664_v63, 4 }
 0x18a   : > { %v421_v1 = vadd.f32 %v664_v63, %v420_v0 }
 0x18c   : > { %v422_v2 = vrot.slane %v421_v1, 2 }
 0x18e   : > { %v423_v3 = vadd.f32 %v422_v2, %v421_v1 }
 0x190   : > { %v424_v4 = vrot.slane %v423_v3, 1 }
 0x192   : > { %v425_v5 = vadd.f32 %v424_v4, %v423_v3 }
 0x194   : > { %665 = vrcp.f32 %v425_v5  ;;  %v437_v9 = vand.u32 2147483648, %v425_v5  ;;  %v435_v11 = vand.u32 2147483647, %v425_v5  ;;  %vm431_vm3 = vweird.f32 %v425_v5 }
 0x196   : > { %v438_v13 = vor.u32 1.1754944e-38, %v437_v9  ;;  %vm436_vm5 = vcmp.eq.f32.partialorder %v435_v11, 8.507059e+37 }
 0x19a   : > { %v666_v6 = vpop.eup %665 }
 0x19b   : > { %v427_v7 = vmul.f32 %v666_v6, %v425_v5  ;;  %vm432_vm2 = vweird.f32 %v666_v6 }
 0x19c   : > { %vm433_vm4 = vmor %vm431_vm3, %vm432_vm2 }
 0x19d   : > { %v428_v8 = vsub.f32 1.0, %v427_v7 }
 0x19f   : > { %v429_v10 = vmul.f32 %v666_v6, %v428_v8 }
 0x1a1   : > { %v430_v12 = vadd.f32 %v666_v6, %v429_v10 }
 0x1a3   : > { %v434_v14 = vsel %vm433_vm4, %v666_v6, %v430_v12 }
 0x1a4   : > { %v439_v15 = vsel %vm436_vm5, %v438_v13, %v434_v14 }
 0x1a5   : > { %v440_v16 = vmul.f32 %v664_v63, %v439_v15 }
 0x1a7   : > { %441 = vst [vmem:[%s218_s26] sm:$0xff] %v440_v16 }
 0x1a8   : > { %694 = shalt.err (!%p691_p3)
}
 0x1a9   : > { %620 = dma.vmem_to_hbm [thread:$0]  (%p800_p5), %s456_s30, 128, %s458_s6, %s443_s22  }
 0x1aa PF: > { %p626_p4 = scmp.ge.s32.totalorder %s729_s21, 2  ;;  %s469_s14 = sand.u32 1, %s717_s18  }
 0x1ab   : > { %s470_s15 = scalar_lea.sflag [#allocation3], %s469_s14 }
 0x1ac   : > { %p623_p7 = pnand %p626_p4, %p804_p6 }
 0x1ae   : > { %p624_p8 = pneg %p623_p7 }
 0x1b0   : > { %712 = dma.done.wait (%p624_p8), %s470_s15, 128  }
 0x1b1   : > { %714 = vsyncadd (%p624_p8), %s470_s15, 4294967168  ;;  %p15_p9 = scmp.ge.s32.totalorder %s787_s24, 4   ;;  %s946_s18 = smov %s721_s19 }
 0x1b2   : > { %s947_s19 = smov %s725_s20  ;;  %s948_s20 = smov %s798_s27 }
 0x1b3   : > { %s949_s21 = smov %s787_s24  ;;  %17 = sbr.rel (!%p15_p9) target bundleno = 3 (0x3), region = 75 }
 0x1b8   :  { %476 = vsyncpa [#allocation3], 1 }
 0x1b9   :  { %478 = vsyncpa [#allocation3 + $0x1], 1 }

</bundles_post_ra>
